<compile_context>
chip_gen: v5e
topology: v5e:2x2
jax: 0.10.0
libtpu: 0.0.40
codegen_flags: <defaults>
</compile_context>

<pallas_src>
import functools

import jax
import jax.numpy as jnp
from jax.experimental import pallas as pl
from jax.experimental.pallas import tpu as pltpu


def _channel_attention_kernel(x_ref, w_ref, out_ref, *, inv_hw):
    """One batch element: x block (1, C, HW) bf16, folded weight (C, C) f32."""
    x = x_ref[0].astype(jnp.float32)                       # (C, HW), f32 math
    avg_p = jnp.sum(x, axis=1, keepdims=True) * inv_hw     # (C, 1)  adaptive avg pool
    max_p = jnp.max(x, axis=1, keepdims=True)              # (C, 1)  adaptive max pool
    pooled = avg_p + max_p                                 # linearity of fc2(fc1(.))
    logits = jnp.dot(w_ref[...], pooled,
                     preferred_element_type=jnp.float32)   # (C, 1)  folded fc2@fc1
    out_ref[0] = jax.nn.sigmoid(logits).astype(out_ref.dtype)


def channel_attention_pallas(x, w_fc1, w_fc2):
    """x: (B, C, H, W) f32; w_fc1: (C//r, C); w_fc2: (C, C//r). Returns (B, C, 1, 1)."""
    B, C, H, W = x.shape
    HW = H * W

    # Lane-dense layout + bf16 at the boundary (halves x DMA); math stays f32 inside.
    x_flat = x.reshape(B, C, HW).astype(jnp.bfloat16)

    # Exact fold of the two bias-free 1x1 convs (no nonlinearity between them).
    # Scoped HIGHEST precision on this tiny host-side matmul only.
    w_fold = jnp.dot(w_fc2, w_fc1,
                     precision=jax.lax.Precision.HIGHEST).astype(jnp.float32)

    # Explicit VMEM budget from the real (double-buffered) block sizes + headroom.
    block_bytes = (2 * C * HW * 2      # x block, bf16, double-buffered
                   + 2 * C * C * 4     # folded weight, f32, double-buffered
                   + 2 * C * 4)        # output block, f32, double-buffered
    vmem_limit = min(64 << 20, block_bytes + (4 << 20))

    fn = pl.pallas_call(
        functools.partial(_channel_attention_kernel, inv_hw=1.0 / HW),
        out_shape=jax.ShapeDtypeStruct((B, C, 1), jnp.float32),
        grid=(B,),
        in_specs=[
            pl.BlockSpec((1, C, HW), lambda b: (b, 0, 0)),   # x, lane-dense
            pl.BlockSpec((C, C), lambda b: (0, 0)),          # folded fc2@fc1
        ],
        out_specs=pl.BlockSpec((1, C, 1), lambda b: (b, 0, 0)),
        compiler_params=pltpu.CompilerParams(
            dimension_semantics=("parallel",),               # shard batch over TCs
            vmem_limit_bytes=vmem_limit),
    )
    out = fn(x_flat, w_fold)
    return out.reshape(B, C, 1, 1)


def channel_attention_reference(x, w_fc1, w_fc2):
    """Pure-JAX reference mirroring the PyTorch forward (no folding, f32)."""
    prec = jax.lax.Precision.HIGHEST
    avg_p = jnp.mean(x, axis=(2, 3))                         # (B, C)
    max_p = jnp.max(x, axis=(2, 3))                          # (B, C)

    def fc(v):
        h = jnp.dot(v, w_fc1.T, precision=prec)              # fc1 (1x1 conv, no bias)
        return jnp.dot(h, w_fc2.T, precision=prec)           # fc2 (1x1 conv, no bias)

    out = jax.nn.sigmoid(fc(avg_p) + fc(max_p))
    return out[:, :, None, None]                             # (B, C, 1, 1)


if __name__ == "__main__":
    B, C, H, W = 2, 4, 16, 16
    r = 2

    key = jax.random.PRNGKey(0)
    kx, k1, k2 = jax.random.split(key, 3)
    x = jax.random.normal(kx, (B, C, H, W), jnp.float32)
    w_fc1 = 0.3 * jax.random.normal(k1, (C // r, C), jnp.float32)
    w_fc2 = 0.3 * jax.random.normal(k2, (C, C // r), jnp.float32)

    out = channel_attention_pallas(x, w_fc1, w_fc2)
    jax.block_until_ready(out)

    ref = channel_attention_reference(x, w_fc1, w_fc2)
    err = float(jnp.max(jnp.abs(out - ref)))
    assert out.shape == (B, C, 1, 1), out.shape
    assert err < 2e-2, f"max abs error {err}"
    print("KERNEL_OK")
</pallas_src>

<mosaic_0001>
module attributes {stable_mosaic.version = 11 : i64} {
  func.func @_channel_attention_kernel(%arg0: i32, %arg1: memref<1x4x256xbf16, #tpu.memory_space<vmem>>, %arg2: memref<4x4xf32, #tpu.memory_space<vmem>>, %arg3: memref<1x4x1xf32, #tpu.memory_space<vmem>>) attributes {dimension_semantics = [#tpu.dimension_semantics<parallel>], iteration_bounds = array<i64: 2>, scalar_prefetch = 0 : i64, scratch_operands = 0 : i64, tpu.core_type = #tpu.core_type<tc>, window_params = [{transform_indices = @transform_0, window_bounds = array<i64: 1, 4, 256>}, {pipeline_mode = #tpu.pipeline_mode<synchronous>, transform_indices = @transform_1, window_bounds = array<i64: 4, 4>}, {transform_indices = @transform_2, window_bounds = array<i64: 1, 4, 1>}]} {
    %c0 = arith.constant 0 : index
    %c0_0 = arith.constant 0 : index
    %c0_1 = arith.constant 0 : index
    %0 = vector.load %arg1[%c0, %c0_0, %c0_1] : memref<1x4x256xbf16, #tpu.memory_space<vmem>>, vector<1x4x256xbf16>
    %1 = vector.shape_cast %0 : vector<1x4x256xbf16> to vector<4x256xbf16>
    %2 = arith.extf %1 : vector<4x256xbf16> to vector<4x256xf32>
    %cst = arith.constant dense<0.000000e+00> : vector<4xf32>
    %3 = vector.multi_reduction <add>, %2, %cst [1] : vector<4x256xf32> to vector<4xf32>
    %4 = vector.shape_cast %3 : vector<4xf32> to vector<4x1xf32>
    %cst_2 = arith.constant 3.906250e-03 : f32
    %5 = vector.broadcast %cst_2 : f32 to vector<4x1xf32>
    %6 = arith.mulf %4, %5 : vector<4x1xf32>
    %cst_3 = arith.constant dense<0xFF800000> : vector<4xf32>
    %7 = vector.multi_reduction <maximumf>, %2, %cst_3 [1] : vector<4x256xf32> to vector<4xf32>
    %8 = vector.shape_cast %7 : vector<4xf32> to vector<4x1xf32>
    %9 = arith.addf %6, %8 : vector<4x1xf32>
    %c0_4 = arith.constant 0 : index
    %c0_5 = arith.constant 0 : index
    %10 = vector.load %arg2[%c0_4, %c0_5] : memref<4x4xf32, #tpu.memory_space<vmem>>, vector<4x4xf32>
    %cst_6 = arith.constant dense<0.000000e+00> : vector<4x1xf32>
    %11 = tpu.matmul %10, %9, %cst_6 {dimension_numbers = #tpu.dot_dimension_numbers<[1], [0], [0], [1], [0, 0, 1, 1], [], []>} : vector<4x4xf32>, vector<4x1xf32>, vector<4x1xf32> -> vector<4x1xf32>
    %12 = arith.negf %11 : vector<4x1xf32>
    %13 = math.exp %12 : vector<4x1xf32>
    %cst_7 = arith.constant 1.000000e+00 : f32
    %14 = vector.broadcast %cst_7 : f32 to vector<4x1xf32>
    %15 = arith.addf %14, %13 : vector<4x1xf32>
    %16 = arith.divf %14, %15 : vector<4x1xf32>
    %c0_8 = arith.constant 0 : index
    %c0_9 = arith.constant 0 : index
    %c0_10 = arith.constant 0 : index
    %17 = vector.load %arg3[%c0_8, %c0_9, %c0_10] : memref<1x4x1xf32, #tpu.memory_space<vmem>>, vector<1x4x1xf32>
    %18 = vector.shape_cast %17 : vector<1x4x1xf32> to vector<4x1xf32>
    %19 = vector.shape_cast %16 : vector<4x1xf32> to vector<1x4x1xf32>
    tpu.vector_store %arg3[%c0_8, %c0_9, %c0_10], %19 {strides = array<i32>} : memref<1x4x1xf32, #tpu.memory_space<vmem>>, vector<1x4x1xf32>,
    return
  }
  func.func @transform_0(%arg0: i32) -> (i32, i32, i32) {
    %c0_i32 = arith.constant 0 : i32
    %c0_i32_0 = arith.constant 0 : i32
    %c0_i32_1 = arith.constant 0 : i32
    return %arg0, %c0_i32, %c0_i32_0 : i32, i32, i32
  }
  func.func @transform_1(%arg0: i32) -> (i32, i32) {
    %c0_i32 = arith.constant 0 : i32
    %c0_i32_0 = arith.constant 0 : i32
    %c0_i32_1 = arith.constant 0 : i32
    return %c0_i32, %c0_i32_0 : i32, i32
  }
  func.func @transform_2(%arg0: i32) -> (i32, i32, i32) {
    %c0_i32 = arith.constant 0 : i32
    %c0_i32_0 = arith.constant 0 : i32
    %c0_i32_1 = arith.constant 0 : i32
    return %arg0, %c0_i32, %c0_i32_0 : i32, i32, i32
  }
}

</mosaic_0001>

<bundles_post_ra>
// kernel: tpu_custom_call.1
= control target key start
LH: loop header
LB: loop body
LE: loop exit
PB: predicated region body
PF: predicated region fallthrough
CT: control target
= control target key end

     0   :  { %7 = vsyncpa [#allocation3], 0  ;;  %s622_s0 = inlined_call_operand.hbm [shape: bf16[2,4,256], index: 0, kind: input, shape index: {}]   ;;  %s623_s1 = inlined_call_operand.hbm [shape: f32[4,4], index: 1, kind: input, shape index: {}]   ;;  %s624_s2 = inlined_call_operand.vmem [shape: f32[2,4,1], index: 2, kind: output, shape index: {}]  }
   0x1   :  { %9 = vsyncpa [#allocation3 + $0x1], 0 }
   0x2   :  { %10 = vsyncpa [#allocation5], 0  ;;  %s514_s9 = smov 0   ;;  %s516_s10 = smov 0  }
   0x3   :  { %s518_s11 = smov 0   ;;  %s520_s12 = smov 0  }
   0x4 LB: > { %s533_s13 = sadd.s32 4294967295, %s496_s12   ;;  %p36_p0 = scmp.ne.s32.totalorder %s488_s10, %s484_s9  ;;  %s496_s12 = sphi %s520_s12, %s631_s12   ;;  %s492_s11 = sphi %s518_s11, %s630_s11   ;;  %s488_s10 = sphi %s516_s10, %s629_s10   ;;  %s484_s9 = sphi %s514_s9, %s628_s9  }
   0x5   : > { %p37_p1 = scmp.eq.s32.totalorder %s533_s13, 0  ;;  %p328_p2 = scmp.ge.s32.totalorder %s496_s12, 1 }
   0x6   : > { %p94_p3 = scmp.lt.s32.totalorder %s496_s12, 3  ;;  %s106_s17 = sshll.u32 %s623_s1, 4  ;;  %s107_s17 = int_to_ptr.hbm [resolvable:$true] %s106_s17 }
   0x7   : > { %p541_p4 = por %p37_p1, %p36_p0  ;;  %s498_s19 = smov [#allocation4]  }
   0x8   : > { %p548_p5 = pnand %p328_p2, %p94_p3  ;;  %s108_s20 = sshll.u32 %s498_s19, 4  ;;  %s109_s20 = int_to_ptr.vmem [resolvable:$true] %s108_s20 }
   0x9   : > { %s557_s21 = sadd.s32 1, %s496_s12   ;;  %s23_s22 = sadd.s32 1, %s492_s11 }
   0xa   : > { %p350_p6 = pneg %p548_p5  ;;  %s20_s23 = ssub.s32 %s496_s12, %s557_s21 }
   0xb   : > { %p21_p8 = scmp.eq.s32.totalorder %s20_s23, 0  ;;  %p30_p9 = scmp.ne.s32.totalorder %s492_s11, %s488_s10 }
   0xc   : > { %p351_p7 = pnand %p350_p6, %p37_p1  ;;  %p31_p10 = scmp.eq.s32.totalorder %s496_s12, 0 }
   0xd   : > { %p359_p11 = scmp.lt.s32.totalorder %s496_s12, 2  ;;  %s119_s25 = sand.u32 1, %s492_s11  }
   0xe   : > { %353 = dma.hbm_to_vmem [thread:$0]  (!%p351_p7), %s107_s17, 64, %s109_s20, [#allocation5]  }
   0xf   : > { %s567_s24 = scalar_select %p21_p8, %s492_s11, %s23_s22  }
  0x10   : > { %p32_p12 = por %p31_p10, %p30_p9  ;;  %s331_s26 = sshll.u32 %s119_s25, 2 }
  0x11   : > { %s343_s27 = sshll.u32 %s496_s12, 2  ;;  %s123_s3 = scalar_lea.vmem [#allocation2], %s331_s26 }
  0x12   : > { %s128_s30 = scalar_lea.hbm %s622_s0, %s343_s27  ;;  %s132_s4 = sshll.u32 %s123_s3, 4  ;;  %s133_s4 = int_to_ptr.vmem [resolvable:$true] %s132_s4 }
  0x13   : > { %s130_s5 = sshll.u32 %s128_s30, 4  ;;  %p574_p13 = pnand %p359_p11, %p32_p12  ;;  %s131_s5 = int_to_ptr.hbm [resolvable:$true] %s130_s5 }
  0x14   : > { %s120_s7 = scalar_lea.sflag [#allocation3], %s119_s25  ;;  %s428_s8 = sshra.s32 %s131_s5, 4  ;;  %s429_s8 = int_to_ptr.hbm [resolvable:$true] %s428_s8 }
  0x15   : > { %s430_s9 = scalar_lea.hbm %s429_s8, 4  ;;  %p432_p2 = pneg %p574_p13 }
  0x16   : > { %p431_p0 = scmp.ne.s32.totalorder %s429_s8, %s430_s9  ;;  %s435_s16 = scalar_lea.hbm %s622_s0, 8 }
  0x17   : > { %p436_p7 = scmp.lt.s32.totalorder %s429_s8, %s622_s0  ;;  %p437_p8 = scmp.lt.s32.totalorder %s435_s16, %s430_s9 }
  0x18   : > { %p433_p3 = pnand %p432_p2, %p431_p0 }
  0x19   : > { %p438_p9 = por %p437_p8, %p436_p7 }
  0x1a   : > { %p434_p6 = pneg %p433_p3 }
  0x1c   : > { %p439_p10 = pnand %p438_p9, %p434_p6 }
  0x1e   : > { %442 = shalt.err (!%p439_p10)
}
  0x1f   : > { %357 = dma.hbm_to_vmem [thread:$0]  (!%p574_p13), %s131_s5, 64, %s133_s4, %s120_s7  }
  0x20   : > { %141 = sbr.rel (%p548_p5) target bundleno = 336 (0x150), region = 28  ;;  %s143_s20 = sand.u32 (!%p548_p5), 1, %s488_s10  }
  0x21   : > { %s335_s22 = sshll.u32 (!%p548_p5), %s143_s20, 2  ;;  %s144_s23 = scalar_lea.sflag (!%p548_p5), [#allocation3], %s143_s20 }
  0x22   : > { %s147_s25 = scalar_lea.vmem (!%p548_p5), [#allocation2], %s335_s22 }
  0x25   : > { %475 = dma.done.wait (%p541_p4), %s144_s23, 64  }
  0x26   : > { %477 = vsyncadd (%p541_p4), %s144_s23, 4294967232 }
  0x27   : > { %479 = dma.done.wait (%p37_p1), [#allocation5], 64  }
  0x28   : > { %481 = vsyncadd (%p37_p1), [#allocation5], 4294967232  ;;  %v177_v0 = vld [vmem:[%s147_s25] sm:$0xf]  ;;  %vm185_vm0 = vcmask 1043456   ;;  %vm204_vm1 = vcmask 31744  }
  0x29   : > { %v178_v1 = vunpack.c.l.bf16 %v177_v0  ;;  %v203_v16 = vld [vmem:[#allocation4] sm:$0xf]  ;;  %p173_p1 = scmp.lt.s32.totalorder %s533_s13, 1  ;;  %vm250_vm5 = vcmask 3072  }
  0x2b   : > { %180 = vst [vmem:[#allocation1] ss:$2 sm:$0xff] %v178_v1  ;;  %s633_s13 = smov (!%p173_p1, %s533_s13), 1 }
  0x2c   : > { %s337_s14 = sshll.u32 %s633_s13, 2 }
  0x2d   : > { %s176_s27 = scalar_lea.vmem %s624_s2, %s337_s14 }
  0x32   : > { %v181_v2 = vld.sshfl [vmem:[#allocation1] sm:$0xff pattern:$0x75316420]  ;;  %v182_v3 = vld.sshfl [vmem:[#allocation1 + $0x8] sm:$0xff pattern:$0x75316420] }
  0x33   : > { %v186_v4 = vsel %vm185_vm0, %v181_v2, 0.0  ;;  %v187_v5 = vsel %vm185_vm0, %v182_v3, 0.0  ;;  %192 = vst [vmem:[#allocation1] ss:$2 sm:$0xff] %v178_v1 }
  0x34   : > { %v188_v6 = vadd.f32 %v187_v5, %v186_v4 }
  0x36   : > { %189 = vadd.xlane.f32.xlu0 %v188_v6 }
  0x3a   : > { %v193_v7 = vld.sshfl [vmem:[#allocation1] sm:$0xff pattern:$0x75316420]  ;;  %v194_v8 = vld.sshfl [vmem:[#allocation1 + $0x8] sm:$0xff pattern:$0x75316420] }
  0x3b   : > { %v197_v9 = vsel %vm185_vm0, %v193_v7, -inf  ;;  %v198_v10 = vsel %vm185_vm0, %v194_v8, -inf }
  0x3c   : > { %v199_v11 = vmax.f32 %v197_v9, %v198_v10 }
  0x3e   : > { %200 = vmax.xlane.f32.xlu0 %v199_v11 }
  0xa9   : > { %v190_v12 = vpop.xlane.xlu0 %189 }
  0xaa   : > { %v191_v13 = vmul.f32 0.00390625, %v190_v12 }
  0xb1   : > { %v201_v14 = vpop.xlane.xlu0 %200 }
  0xb2   : > { %v202_v15 = vadd.f32 %v201_v14, %v191_v13 }
  0xb4   : > { %338 = vmatpush.msk.msra.mxu0 %vm185_vm0, %v202_v15 }
  0xb5   : > { %339 = vmatmul.msk.f32.vlgmr.msra.gmra.mxu0 %vm204_vm1, %v203_v16 }
 0x132   : > { %v228_v17 = vpop.f32.mrf.mxu0 }
 0x133   : > { %v340_v18 = vmul.f32 -1.442695, %v228_v17 }
 0x135   : > { %394 = vpow2.f32 %v340_v18 }
 0x13b   : > { %v395_v19 = vpop.eup %394 }
 0x13c   : > { %v234_v20 = vadd.f32 1.0, %v395_v19 }
 0x13e   : > { %396 = vrcp.f32 %v234_v20  ;;  %v246_v24 = vand.u32 2147483648, %v234_v20  ;;  %v244_v26 = vand.u32 2147483647, %v234_v20  ;;  %vm240_vm3 = vweird.f32 %v234_v20 }
 0x140   : > { %v247_v28 = vor.u32 1.1754944e-38, %v246_v24  ;;  %vm245_vm6 = vcmp.eq.f32.partialorder %v244_v26, 8.507059e+37 }
 0x144   : > { %v397_v21 = vpop.eup %396 }
 0x145   : > { %v236_v22 = vmul.f32 %v397_v21, %v234_v20  ;;  %vm241_vm2 = vweird.f32 %v397_v21 }
 0x146   : > { %vm242_vm4 = vmor %vm240_vm3, %vm241_vm2 }
 0x147   : > { %v237_v23 = vsub.f32 1.0, %v236_v22 }
 0x149   : > { %v238_v25 = vmul.f32 %v397_v21, %v237_v23 }
 0x14b   : > { %v239_v27 = vadd.f32 %v397_v21, %v238_v25 }
 0x14d   : > { %v243_v29 = vsel %vm242_vm4, %v397_v21, %v239_v27 }
 0x14e   : > { %v248_v30 = vsel %vm245_vm6, %v247_v28, %v243_v29 }
 0x14f   : > { %251 = vst.msk [vmem:[%s176_s27] sm:$0xf] %vm250_vm5, %v248_v30 }
 0x150 PF: > { %p13_p4 = scmp.ge.s32.totalorder %s557_s21, 4   ;;  %s628_s9 = smov %s488_s10 }
 0x151   : > { %s629_s10 = smov %s492_s11  ;;  %s630_s11 = smov %s567_s24 }
 0x152   : > { %s631_s12 = smov %s557_s21  ;;  %15 = sbr.rel (!%p13_p4) target bundleno = 4 (0x4), region = 72 }
 0x157   :  { %271 = vsyncpa [#allocation3], 1 }
 0x158   :  { %273 = vsyncpa [#allocation3 + $0x1], 1 }
 0x159   :  { %274 = vsyncpa [#allocation5], 1 }

</bundles_post_ra>
